<compile_context>
chip_gen: v7x
topology: tpu7x:2x2x1
jax: 0.10.0
libtpu: 0.0.40
codegen_flags: <defaults>
</compile_context>

<pallas_src>
import functools

import jax
import jax.numpy as jnp
from jax.experimental import pallas as pl
from jax.experimental.pallas import tpu as pltpu


# ------------------------------------------------------------------ config

_LANE = 512                      # lane-dense last dim (multiple of 128)
_STRIP_ROWS = 256                # rows per in-kernel accumulation strip
_MIN_PALLAS_ELEMS = 32 * 1024    # below this, plain jnp (launch overhead wins)
_MIN_BLOCK_ROWS = 128            # refuse degenerate tilings (tiny divisors)
_SUBLANE = {1: 32, 2: 16, 4: 8}  # itemsize -> minimum sublane tile


@functools.lru_cache(maxsize=1)
def _chip_cfg():
    """(max_block_rows, vmem_limit_bytes) tuned per TPU generation."""
    try:
        kind = jax.devices()[0].device_kind.lower()
    except Exception:  # pragma: no cover - defensive
        kind = ""
    if "v7" in kind:
        # v7x: 3.2 TB/s HBM, 64 MiB physical VMEM.  grad = (2 in + 1 out)
        # * 4 MiB * 2 buffers = 24 MiB; strip-accumulated energy temps stay
        # small, so 48 MiB scoped leaves headroom.
        return 2048, 48 * 1024 * 1024
    if "v6" in kind:
        # v6e: 128 MiB physical VMEM, plenty of headroom.
        return 2048, 64 * 1024 * 1024
    # v5e / unknown: 1024x512 blocks already amortize step overhead (<5%).
    return 1024, 40 * 1024 * 1024


def _plan(n_elems, dtype):
    """Zero-copy slab plan (rows, block_rows, vmem_limit) or None -> jnp fallback."""
    if n_elems < _MIN_PALLAS_ELEMS:
        return None                       # tiny: kernel launch overhead dominates
    sub = _SUBLANE.get(jnp.dtype(dtype).itemsize)
    if sub is None:
        return None
    if n_elems % _LANE:
        return None                       # unaligned: would need a padded copy
    rows = n_elems // _LANE
    if rows % sub:
        return None                       # sublane-unaligned rows
    max_rows, vmem = _chip_cfg()
    if rows <= max_rows:
        return rows, rows, vmem           # single full block (dims == array dims)
    # Largest divisor of `rows` that is a multiple of `sub` and <= max_rows,
    # so aligned inputs never need padding / rounding up to whole blocks.
    units = rows // sub
    br = 0
    for u in range(min(max_rows // sub, units), 0, -1):
        if units % u == 0:
            br = u * sub
            break
    if br < _MIN_BLOCK_ROWS:
        return None                       # degenerate tiling -> jnp fallback
    return rows, br, vmem


def _compiler_params(vmem_limit):
    return pltpu.CompilerParams(
        dimension_semantics=("parallel",),   # independent blocks; both v7x TCs stream HBM
        vmem_limit_bytes=vmem_limit,
    )


# ------------------------------------------------------------------ kernels

def _grad_kernel(x_ref, z_ref, o_ref):
    # grad of 0.5*||x - z||^2  ->  x - z
    o_ref[...] = (x_ref[...] - z_ref[...]).astype(o_ref.dtype)


def _prox_kernel(tp_ref, x_ref, z_ref, o_ref):
    # tp_ref (SMEM, scalar prefetch): [tau, 1/(1+tau)]
    # argmin_u 0.5*||u - z||^2 + (1/(2*tau))*||u - x||^2
    tau = tp_ref[0]
    inv = tp_ref[1]
    o_ref[...] = ((x_ref[...] + tau * z_ref[...]) * inv).astype(o_ref.dtype)


def _accumulate_strips(block_rows, strip_fn):
    """Fold strip_fn(row0, nrows, acc) over the block in <= _STRIP_ROWS chunks.

    Keeps live temporaries to one strip (<= 256 x 512 f32 = 512 KiB) instead of
    block-sized temps, so the bigger v7x/v6e blocks stay inside the VMEM budget.
    """
    strip_rows = min(block_rows, _STRIP_ROWS)        # multiple of 8 (block_rows is)
    nfull = block_rows // strip_rows
    rem = block_rows - nfull * strip_rows            # multiple of 8
    acc = jnp.zeros((8, _LANE), jnp.float32)
    if nfull == 1:
        acc = strip_fn(0, strip_rows, acc)
    else:
        def body(i, a):
            lo = pl.multiple_of(i * strip_rows, strip_rows)
            return strip_fn(lo, strip_rows, a)
        acc = jax.lax.fori_loop(0, nfull, body, acc)
    if rem:
        acc = strip_fn(nfull * strip_rows, rem, acc)
    return acc


def _energy_kernel(x_ref, z_ref, p_ref):
    # Per-block (8, _LANE) partial sum of (x - z)^2, accumulated strip-wise.
    # The adds are pure VPU work (filler under the DMA bottleneck); the final
    # cross-lane/sublane reduction happens once, in the wrapper.
    br = x_ref.shape[0]

    def strip(lo, nrows, acc):
        d = (x_ref[pl.ds(lo, nrows), :].astype(jnp.float32)
             - z_ref[pl.ds(lo, nrows), :].astype(jnp.float32))
        d2 = d * d
        return acc + jnp.sum(d2.reshape(nrows // 8, 8, _LANE), axis=0)

    p_ref[...] = _accumulate_strips(br, strip)[None]


def _grad_energy_kernel(x_ref, z_ref, g_ref, p_ref):
    # Fused: compute d = x - z once per strip, write the gradient block and
    # accumulate the (8, _LANE) energy partial — saves one full HBM pass.
    br = x_ref.shape[0]

    def strip(lo, nrows, acc):
        d = x_ref[pl.ds(lo, nrows), :] - z_ref[pl.ds(lo, nrows), :]
        g_ref[pl.ds(lo, nrows), :] = d.astype(g_ref.dtype)
        d32 = d.astype(jnp.float32)
        return acc + jnp.sum((d32 * d32).reshape(nrows // 8, 8, _LANE), axis=0)

    p_ref[...] = _accumulate_strips(br, strip)[None]


# ------------------------------------------------------------------ jitted wrappers

@jax.jit
def _grad_impl(x, z):
    plan = _plan(x.size, x.dtype)
    if plan is None:
        return x - z   # tiny / unaligned: XLA fuses this at the HBM roofline
    m, br, vmem = plan
    spec = pl.BlockSpec((br, _LANE), lambda i: (i, 0))
    out = pl.pallas_call(
        _grad_kernel,
        out_shape=jax.ShapeDtypeStruct((m, _LANE), x.dtype),
        grid_spec=pltpu.PrefetchScalarGridSpec(
            num_scalar_prefetch=0, grid=(m // br,),
            in_specs=[spec, spec], out_specs=spec),
        compiler_params=_compiler_params(vmem),
    )(x.reshape(m, _LANE), z.reshape(m, _LANE))
    return out.reshape(x.shape)


@jax.jit
def _prox_impl(x, z, tau):
    tau = jnp.asarray(tau, jnp.float32)
    plan = _plan(x.size, x.dtype)
    if plan is None:
        return ((x + tau * z) / (1.0 + tau)).astype(x.dtype)
    m, br, vmem = plan
    tau_params = jnp.stack([tau, 1.0 / (1.0 + tau)])      # (2,) f32 -> SMEM
    spec = pl.BlockSpec((br, _LANE), lambda i, tp: (i, 0))
    out = pl.pallas_call(
        _prox_kernel,
        out_shape=jax.ShapeDtypeStruct((m, _LANE), x.dtype),
        grid_spec=pltpu.PrefetchScalarGridSpec(
            num_scalar_prefetch=1, grid=(m // br,),
            in_specs=[spec, spec], out_specs=spec),
        compiler_params=_compiler_params(vmem),
    )(tau_params, x.reshape(m, _LANE), z.reshape(m, _LANE))
    return out.reshape(x.shape)


@jax.jit
def _energy_impl(x, z):
    plan = _plan(x.size, x.dtype)
    if plan is None:
        d = (x - z).astype(jnp.float32)
        return 0.5 * jnp.sum(d * d)
    m, br, vmem = plan
    nblk = m // br
    spec = pl.BlockSpec((br, _LANE), lambda i: (i, 0))
    partials = pl.pallas_call(
        _energy_kernel,
        out_shape=jax.ShapeDtypeStruct((nblk, 8, _LANE), jnp.float32),
        grid_spec=pltpu.PrefetchScalarGridSpec(
            num_scalar_prefetch=0, grid=(nblk,),
            in_specs=[spec, spec],
            out_specs=pl.BlockSpec((1, 8, _LANE), lambda i: (i, 0, 0))),
        compiler_params=_compiler_params(vmem),
    )(x.reshape(m, _LANE), z.reshape(m, _LANE))
    return 0.5 * jnp.sum(partials)


@jax.jit
def _grad_energy_impl(x, z):
    plan = _plan(x.size, x.dtype)
    if plan is None:
        d = x - z
        d32 = d.astype(jnp.float32)
        return d, 0.5 * jnp.sum(d32 * d32)
    m, br, vmem = plan
    nblk = m // br
    spec = pl.BlockSpec((br, _LANE), lambda i: (i, 0))
    g, partials = pl.pallas_call(
        _grad_energy_kernel,
        out_shape=(
            jax.ShapeDtypeStruct((m, _LANE), x.dtype),
            jax.ShapeDtypeStruct((nblk, 8, _LANE), jnp.float32),
        ),
        grid_spec=pltpu.PrefetchScalarGridSpec(
            num_scalar_prefetch=0, grid=(nblk,),
            in_specs=[spec, spec],
            out_specs=[spec, pl.BlockSpec((1, 8, _LANE), lambda i: (i, 0, 0))]),
        compiler_params=_compiler_params(vmem),
    )(x.reshape(m, _LANE), z.reshape(m, _LANE))
    return g.reshape(x.shape), 0.5 * jnp.sum(partials)


# ------------------------------------------------------------------ module

class DatatermPallas:
    """Quadratic dataterm D(x) = 0.5*||x - z||^2 with Pallas TPU kernels."""

    def __init__(self, config=None):
        del config          # reference __init__ ignores config, holds no params
        self._z = None

    def set_target(self, z):
        """Cache the fixed observation z across solver iterations.
        No pre-slabbed copy is needed: the aligned fast path reshapes for free."""
        self._z = z
        return self

    def _target(self, z):
        if z is not None:
            return z
        if self._z is None:
            raise ValueError("no target z: pass z or call set_target(z) first")
        return self._z

    def forward(self, x, *args):
        # TODO(synk): abstract in the reference module (raises); kept abstract.
        raise NotImplementedError

    def grad(self, x, z=None):
        return _grad_impl(x, self._target(z))

    def prox(self, x, z=None, tau=1.0):
        return _prox_impl(x, self._target(z), tau)

    def energy(self, x, z=None):
        return _energy_impl(x, self._target(z))

    def grad_energy(self, x, z=None):
        """Fused grad + energy (one HBM pass over x and z)."""
        return _grad_energy_impl(x, self._target(z))


# ------------------------------------------------------------------ main

if __name__ == "__main__":
    key = jax.random.PRNGKey(0)
    ks = jax.random.split(key, 10)
    dt = DatatermPallas(config=None)

    # ---- primary test: small NCHW shape on the zero-copy Pallas path
    #      (2*4*64*64 = 32768 elems -> single 64 x 512 block, no pad, no slice)
    x = jax.random.normal(ks[0], (2, 4, 64, 64), dtype=jnp.float32)
    z = jax.random.normal(ks[1], (2, 4, 64, 64), dtype=jnp.float32)
    tau = 0.5

    g = jax.block_until_ready(dt.grad(x, z))
    p = jax.block_until_ready(dt.prox(x, z, tau))
    e = jax.block_until_ready(dt.energy(x, z))
    gf, ef = dt.grad_energy(x, z)
    gf = jax.block_until_ready(gf)
    ef = jax.block_until_ready(ef)

    g_ref = x - z
    p_ref = (x + tau * z) / (1.0 + tau)
    e_ref = 0.5 * jnp.sum((x - z) ** 2)

    assert g.shape == x.shape and g.dtype == x.dtype
    assert p.shape == x.shape and p.dtype == x.dtype
    assert jnp.allclose(g, g_ref, atol=1e-5, rtol=1e-5)
    assert jnp.allclose(p, p_ref, atol=1e-5, rtol=1e-5)
    assert jnp.allclose(e, e_ref, atol=1e-3, rtol=1e-4)
    assert jnp.allclose(gf, g_ref, atol=1e-5, rtol=1e-5)
    assert jnp.allclose(ef, e_ref, atol=1e-3, rtol=1e-4)

    # prox with a different tau: no retrace (tau is a traced SMEM scalar)
    tau2 = 1.25
    p2 = jax.block_until_ready(dt.prox(x, z, tau2))
    assert jnp.allclose(p2, (x + tau2 * z) / (1.0 + tau2), atol=1e-5, rtol=1e-5)

    # ---- tiny input: short-circuits to plain fused jnp (no kernel launch)
    xt = jax.random.normal(ks[2], (2, 4, 16, 16), dtype=jnp.float32)
    zt = jax.random.normal(ks[3], (2, 4, 16, 16), dtype=jnp.float32)
    assert jnp.allclose(dt.grad(xt, zt), xt - zt, atol=1e-6)
    assert jnp.allclose(dt.energy(xt, zt), 0.5 * jnp.sum((xt - zt) ** 2),
                        atol=1e-3, rtol=1e-5)

    # ---- multi-block aligned shape (8192 slab rows -> >=4 blocks on any chip)
    dt.set_target(jax.random.normal(ks[4], (16, 16, 128, 128), dtype=jnp.float32))
    xb = jax.random.normal(ks[5], (16, 16, 128, 128), dtype=jnp.float32)
    gb = jax.block_until_ready(dt.grad(xb))
    eb = jax.block_until_ready(dt.energy(xb))
    gfb, efb = dt.grad_energy(xb)
    gfb = jax.block_until_ready(gfb)
    eb_ref = 0.5 * jnp.sum((xb - dt._z) ** 2)
    assert jnp.allclose(gb, xb - dt._z, atol=1e-5, rtol=1e-5)
    assert jnp.allclose(gfb, xb - dt._z, atol=1e-5, rtol=1e-5)
    assert jnp.allclose(eb, eb_ref, rtol=1e-4)
    assert jnp.allclose(jax.block_until_ready(efb), eb_ref, rtol=1e-4)

    # ---- aligned shape whose row count (1032) is not a multiple of the max
    #      block: exercises the divisor-based block choice (still zero-copy)
    xo = jax.random.normal(ks[6], (4, 4, 256, 129), dtype=jnp.float32)
    zo = jax.random.normal(ks[7], (4, 4, 256, 129), dtype=jnp.float32)
    go = jax.block_until_ready(dt.grad(xo, zo))
    eo = jax.block_until_ready(dt.energy(xo, zo))
    assert jnp.allclose(go, xo - zo, atol=1e-5, rtol=1e-5)
    assert jnp.allclose(eo, 0.5 * jnp.sum((xo - zo) ** 2), rtol=1e-4)

    # ---- unaligned rows (1250 not a multiple of 8) -> jnp fallback path
    xm = jax.random.normal(ks[8], (4, 4, 160, 250), dtype=jnp.float32)
    zm = jax.random.normal(ks[9], (4, 4, 160, 250), dtype=jnp.float32)
    assert jnp.allclose(dt.grad(xm, zm), xm - zm, atol=1e-6)
    assert jnp.allclose(dt.energy(xm, zm), 0.5 * jnp.sum((xm - zm) ** 2), rtol=1e-4)

    # ---- bf16 (dtype-aware 16-row sublane alignment) on the Pallas path
    xh = x.astype(jnp.bfloat16)
    zh = z.astype(jnp.bfloat16)
    gh = jax.block_until_ready(dt.grad(xh, zh))
    assert gh.dtype == jnp.bfloat16
    assert jnp.allclose(gh.astype(jnp.float32), (xh - zh).astype(jnp.float32),
                        atol=1e-2, rtol=1e-2)

    print("KERNEL_OK")
</pallas_src>

<mosaic_0001>
module attributes {stable_mosaic.version = 11 : i64} {
  func.func @_grad_kernel(%arg0: i32, %arg1: memref<64x512xf32, #tpu.memory_space<vmem>>, %arg2: memref<64x512xf32, #tpu.memory_space<vmem>>, %arg3: memref<64x512xf32, #tpu.memory_space<vmem>>) attributes {dimension_semantics = [#tpu.dimension_semantics<parallel>], iteration_bounds = array<i64: 1>, scalar_prefetch = 0 : i64, scratch_operands = 0 : i64, tpu.core_type = #tpu.core_type<tc>, window_params = [{transform_indices = @transform_0, window_bounds = array<i64: 64, 512>}, {transform_indices = @transform_1, window_bounds = array<i64: 64, 512>}, {transform_indices = @transform_2, window_bounds = array<i64: 64, 512>}]} {
    %c0 = arith.constant 0 : index
    %c0_0 = arith.constant 0 : index
    %0 = vector.load %arg1[%c0, %c0_0] : memref<64x512xf32, #tpu.memory_space<vmem>>, vector<64x512xf32>
    %c0_1 = arith.constant 0 : index
    %c0_2 = arith.constant 0 : index
    %1 = vector.load %arg2[%c0_1, %c0_2] : memref<64x512xf32, #tpu.memory_space<vmem>>, vector<64x512xf32>
    %2 = arith.subf %0, %1 : vector<64x512xf32>
    %c0_3 = arith.constant 0 : index
    %c0_4 = arith.constant 0 : index
    %3 = vector.load %arg3[%c0_3, %c0_4] : memref<64x512xf32, #tpu.memory_space<vmem>>, vector<64x512xf32>
    tpu.vector_store %arg3[%c0_3, %c0_4], %2 {strides = array<i32>} : memref<64x512xf32, #tpu.memory_space<vmem>>, vector<64x512xf32>,
    return
  }
  func.func @transform_0(%arg0: i32) -> (i32, i32) {
    %c0_i32 = arith.constant 0 : i32
    %c0_i32_0 = arith.constant 0 : i32
    return %arg0, %c0_i32 : i32, i32
  }
  func.func @transform_1(%arg0: i32) -> (i32, i32) {
    %c0_i32 = arith.constant 0 : i32
    %c0_i32_0 = arith.constant 0 : i32
    return %arg0, %c0_i32 : i32, i32
  }
  func.func @transform_2(%arg0: i32) -> (i32, i32) {
    %c0_i32 = arith.constant 0 : i32
    %c0_i32_0 = arith.constant 0 : i32
    return %arg0, %c0_i32 : i32, i32
  }
}

</mosaic_0001>

<bundles_post_ra>
// kernel: _grad_impl.1
= control target key start
LH: loop header
LB: loop body
LE: loop exit
PB: predicated region body
PF: predicated region fallthrough
CT: control target
= control target key end

     0   :  { %s446_s0 = inlined_call_operand.vmem [shape: f32[64,512], index: 0, kind: input, shape index: {}]   ;;  %s447_s1 = inlined_call_operand.vmem [shape: f32[64,512], index: 1, kind: input, shape index: {}]   ;;  %s448_s2 = inlined_call_operand.vmem [shape: f32[64,512], index: 2, kind: output, shape index: {}]  }
   0x1   :  { %v11_v0 = vld [vmem:[%s446_s0] sm:$0xff]  ;;  %v12_v2 = vld [vmem:[%s446_s0 + $0x8] sm:$0xff]  ;;  %v13_v5 = vld [vmem:[%s446_s0 + $0x10] sm:$0xff] }
   0x2   :  { %v43_v1 = vld [vmem:[%s447_s1] sm:$0xff]  ;;  %v44_v4 = vld [vmem:[%s447_s1 + $0x8] sm:$0xff]  ;;  %v45_v6 = vld [vmem:[%s447_s1 + $0x10] sm:$0xff] }
   0x3   :  { %v75_v3 = vsub.f32 %v11_v0, %v43_v1  ;;  %v76_v7 = vsub.f32 %v12_v2, %v44_v4  ;;  %v77_v8 = vsub.f32 %v13_v5, %v45_v6  ;;  %v14_v9 = vld [vmem:[%s446_s0 + $0x18] sm:$0xff]  ;;  %v15_v11 = vld [vmem:[%s446_s0 + $0x20] sm:$0xff]  ;;  %v16_v14 = vld [vmem:[%s446_s0 + $0x28] sm:$0xff] }
   0x4   :  { %v46_v10 = vld [vmem:[%s447_s1 + $0x18] sm:$0xff]  ;;  %v47_v13 = vld [vmem:[%s447_s1 + $0x20] sm:$0xff]  ;;  %v48_v15 = vld [vmem:[%s447_s1 + $0x28] sm:$0xff] }
   0x5   :  { %107 = vst [vmem:[%s448_s2] sm:$0xff] %v75_v3  ;;  %v78_v12 = vsub.f32 %v14_v9, %v46_v10  ;;  %108 = vst [vmem:[%s448_s2 + $0x8] sm:$0xff] %v76_v7  ;;  %v79_v16 = vsub.f32 %v15_v11, %v47_v13  ;;  %v80_v17 = vsub.f32 %v16_v14, %v48_v15  ;;  %v17_v18 = vld [vmem:[%s446_s0 + $0x30] sm:$0xff]  ;;  %v18_v20 = vld [vmem:[%s446_s0 + $0x38] sm:$0xff] }
   0x6   :  { %109 = vst [vmem:[%s448_s2 + $0x10] sm:$0xff] %v77_v8  ;;  %v49_v19 = vld [vmem:[%s447_s1 + $0x30] sm:$0xff]  ;;  %v50_v22 = vld [vmem:[%s447_s1 + $0x38] sm:$0xff]  ;;  %v19_v23 = vld [vmem:[%s446_s0 + $0x40] sm:$0xff] }
   0x7   :  { %110 = vst [vmem:[%s448_s2 + $0x18] sm:$0xff] %v78_v12  ;;  %v81_v21 = vsub.f32 %v17_v18, %v49_v19  ;;  %v51_v24 = vld [vmem:[%s447_s1 + $0x40] sm:$0xff]  ;;  %111 = vst [vmem:[%s448_s2 + $0x20] sm:$0xff] %v79_v16  ;;  %v82_v25 = vsub.f32 %v18_v20, %v50_v22  ;;  %v20_v27 = vld [vmem:[%s446_s0 + $0x48] sm:$0xff] }
   0x8   :  { %112 = vst [vmem:[%s448_s2 + $0x28] sm:$0xff] %v80_v17  ;;  %v83_v26 = vsub.f32 %v19_v23, %v51_v24  ;;  %v52_v28 = vld [vmem:[%s447_s1 + $0x48] sm:$0xff]  ;;  %v21_v29 = vld [vmem:[%s446_s0 + $0x50] sm:$0xff]  ;;  %v22_v32 = vld [vmem:[%s446_s0 + $0x58] sm:$0xff] }
   0x9   :  { %113 = vst [vmem:[%s448_s2 + $0x30] sm:$0xff] %v81_v21  ;;  %v84_v30 = vsub.f32 %v20_v27, %v52_v28  ;;  %v53_v31 = vld [vmem:[%s447_s1 + $0x50] sm:$0xff]  ;;  %v54_v33 = vld [vmem:[%s447_s1 + $0x58] sm:$0xff]  ;;  %114 = vst [vmem:[%s448_s2 + $0x38] sm:$0xff] %v82_v25 }
   0xa   :  { %115 = vst [vmem:[%s448_s2 + $0x40] sm:$0xff] %v83_v26  ;;  %v85_v34 = vsub.f32 %v21_v29, %v53_v31  ;;  %v86_v35 = vsub.f32 %v22_v32, %v54_v33  ;;  %v23_v36 = vld [vmem:[%s446_s0 + $0x60] sm:$0xff]  ;;  %v24_v38 = vld [vmem:[%s446_s0 + $0x68] sm:$0xff]  ;;  %v25_v41 = vld [vmem:[%s446_s0 + $0x70] sm:$0xff] }
   0xb   :  { %v55_v37 = vld [vmem:[%s447_s1 + $0x60] sm:$0xff]  ;;  %116 = vst [vmem:[%s448_s2 + $0x48] sm:$0xff] %v84_v30  ;;  %v56_v40 = vld [vmem:[%s447_s1 + $0x68] sm:$0xff]  ;;  %v57_v42 = vld [vmem:[%s447_s1 + $0x70] sm:$0xff] }
   0xc   :  { %v87_v39 = vsub.f32 %v23_v36, %v55_v37  ;;  %117 = vst [vmem:[%s448_s2 + $0x50] sm:$0xff] %v85_v34  ;;  %118 = vst [vmem:[%s448_s2 + $0x58] sm:$0xff] %v86_v35  ;;  %v88_v43 = vsub.f32 %v24_v38, %v56_v40  ;;  %v89_v44 = vsub.f32 %v25_v41, %v57_v42  ;;  %v26_v45 = vld [vmem:[%s446_s0 + $0x78] sm:$0xff]  ;;  %v27_v47 = vld [vmem:[%s446_s0 + $0x80] sm:$0xff] }
   0xd   :  { %v58_v46 = vld [vmem:[%s447_s1 + $0x78] sm:$0xff]  ;;  %v59_v49 = vld [vmem:[%s447_s1 + $0x80] sm:$0xff]  ;;  %v28_v50 = vld [vmem:[%s446_s0 + $0x88] sm:$0xff] }
   0xe   :  { %119 = vst [vmem:[%s448_s2 + $0x60] sm:$0xff] %v87_v39  ;;  %v90_v48 = vsub.f32 %v26_v45, %v58_v46  ;;  %v60_v51 = vld [vmem:[%s447_s1 + $0x88] sm:$0xff]  ;;  %120 = vst [vmem:[%s448_s2 + $0x68] sm:$0xff] %v88_v43  ;;  %v91_v52 = vsub.f32 %v27_v47, %v59_v49  ;;  %v29_v54 = vld [vmem:[%s446_s0 + $0x90] sm:$0xff] }
   0xf   :  { %121 = vst [vmem:[%s448_s2 + $0x70] sm:$0xff] %v89_v44  ;;  %v92_v53 = vsub.f32 %v28_v50, %v60_v51  ;;  %v61_v55 = vld [vmem:[%s447_s1 + $0x90] sm:$0xff]  ;;  %v30_v56 = vld [vmem:[%s446_s0 + $0x98] sm:$0xff]  ;;  %v31_v59 = vld [vmem:[%s446_s0 + $0xa0] sm:$0xff] }
  0x10   :  { %122 = vst [vmem:[%s448_s2 + $0x78] sm:$0xff] %v90_v48  ;;  %v93_v57 = vsub.f32 %v29_v54, %v61_v55  ;;  %v62_v58 = vld [vmem:[%s447_s1 + $0x98] sm:$0xff]  ;;  %v63_v60 = vld [vmem:[%s447_s1 + $0xa0] sm:$0xff]  ;;  %123 = vst [vmem:[%s448_s2 + $0x80] sm:$0xff] %v91_v52 }
  0x11   :  { %124 = vst [vmem:[%s448_s2 + $0x88] sm:$0xff] %v92_v53  ;;  %v94_v61 = vsub.f32 %v30_v56, %v62_v58  ;;  %v95_v62 = vsub.f32 %v31_v59, %v63_v60  ;;  %v32_v63 = vld [vmem:[%s446_s0 + $0xa8] sm:$0xff]  ;;  %v33_v1 = vld [vmem:[%s446_s0 + $0xb0] sm:$0xff]  ;;  %v34_v4 = vld [vmem:[%s446_s0 + $0xb8] sm:$0xff] }
  0x12   :  { %v64_v0 = vld [vmem:[%s447_s1 + $0xa8] sm:$0xff]  ;;  %125 = vst [vmem:[%s448_s2 + $0x90] sm:$0xff] %v93_v57  ;;  %v65_v3 = vld [vmem:[%s447_s1 + $0xb0] sm:$0xff]  ;;  %v66_v5 = vld [vmem:[%s447_s1 + $0xb8] sm:$0xff] }
  0x13   :  { %v96_v2 = vsub.f32 %v32_v63, %v64_v0  ;;  %126 = vst [vmem:[%s448_s2 + $0x98] sm:$0xff] %v94_v61  ;;  %127 = vst [vmem:[%s448_s2 + $0xa0] sm:$0xff] %v95_v62  ;;  %v97_v6 = vsub.f32 %v33_v1, %v65_v3  ;;  %v98_v7 = vsub.f32 %v34_v4, %v66_v5  ;;  %v35_v8 = vld [vmem:[%s446_s0 + $0xc0] sm:$0xff]  ;;  %v36_v10 = vld [vmem:[%s446_s0 + $0xc8] sm:$0xff] }
  0x14   :  { %v67_v9 = vld [vmem:[%s447_s1 + $0xc0] sm:$0xff]  ;;  %v68_v12 = vld [vmem:[%s447_s1 + $0xc8] sm:$0xff]  ;;  %v37_v13 = vld [vmem:[%s446_s0 + $0xd0] sm:$0xff] }
  0x15   :  { %128 = vst [vmem:[%s448_s2 + $0xa8] sm:$0xff] %v96_v2  ;;  %v99_v11 = vsub.f32 %v35_v8, %v67_v9  ;;  %v69_v14 = vld [vmem:[%s447_s1 + $0xd0] sm:$0xff]  ;;  %129 = vst [vmem:[%s448_s2 + $0xb0] sm:$0xff] %v97_v6  ;;  %v100_v15 = vsub.f32 %v36_v10, %v68_v12  ;;  %v38_v17 = vld [vmem:[%s446_s0 + $0xd8] sm:$0xff] }
  0x16   :  { %130 = vst [vmem:[%s448_s2 + $0xb8] sm:$0xff] %v98_v7  ;;  %v101_v16 = vsub.f32 %v37_v13, %v69_v14  ;;  %v70_v18 = vld [vmem:[%s447_s1 + $0xd8] sm:$0xff]  ;;  %v39_v19 = vld [vmem:[%s446_s0 + $0xe0] sm:$0xff]  ;;  %v40_v22 = vld [vmem:[%s446_s0 + $0xe8] sm:$0xff] }
  0x17   :  { %131 = vst [vmem:[%s448_s2 + $0xc0] sm:$0xff] %v99_v11  ;;  %v102_v20 = vsub.f32 %v38_v17, %v70_v18  ;;  %v71_v21 = vld [vmem:[%s447_s1 + $0xe0] sm:$0xff]  ;;  %v72_v23 = vld [vmem:[%s447_s1 + $0xe8] sm:$0xff]  ;;  %132 = vst [vmem:[%s448_s2 + $0xc8] sm:$0xff] %v100_v15 }
  0x18   :  { %133 = vst [vmem:[%s448_s2 + $0xd0] sm:$0xff] %v101_v16  ;;  %v103_v24 = vsub.f32 %v39_v19, %v71_v21  ;;  %v104_v25 = vsub.f32 %v40_v22, %v72_v23  ;;  %v41_v26 = vld [vmem:[%s446_s0 + $0xf0] sm:$0xff]  ;;  %v42_v28 = vld [vmem:[%s446_s0 + $0xf8] sm:$0xff] }
  0x19   :  { %v73_v27 = vld [vmem:[%s447_s1 + $0xf0] sm:$0xff]  ;;  %134 = vst [vmem:[%s448_s2 + $0xd8] sm:$0xff] %v102_v20  ;;  %v74_v30 = vld [vmem:[%s447_s1 + $0xf8] sm:$0xff] }
  0x1a   :  { %v105_v29 = vsub.f32 %v41_v26, %v73_v27  ;;  %135 = vst [vmem:[%s448_s2 + $0xe0] sm:$0xff] %v103_v24  ;;  %136 = vst [vmem:[%s448_s2 + $0xe8] sm:$0xff] %v104_v25  ;;  %v106_v31 = vsub.f32 %v42_v28, %v74_v30 }
  0x1c   :  { %137 = vst [vmem:[%s448_s2 + $0xf0] sm:$0xff] %v105_v29  ;;  %138 = vst [vmem:[%s448_s2 + $0xf8] sm:$0xff] %v106_v31 }

</bundles_post_ra>
